<compile_context>
chip_gen: v7x
topology: tpu7x:2x2x1
jax: 0.10.0
libtpu: 0.0.40
codegen_flags: <defaults>
</compile_context>

<pallas_src>
import math

import jax
import jax.numpy as jnp
from jax.experimental import pallas as pl
from jax.experimental.pallas import tpu as pltpu


def _cdiv(a, b):
    return (a + b - 1) // b


def _round_up(x, m):
    return _cdiv(x, m) * m


def _mlp_kernel(st_ref, ac_ref,
                w1s_ref, w1a_ref, b1_ref,
                w2_ref, b2_ref,
                w3_ref, b3_ref,
                out_ref):
    # Transposed, lane-dense blocks: (feat, TILE_B), batch on the lane axis.
    st = st_ref[...]                                   # (S, TB) f32
    ac = ac_ref[...]                                   # (A, TB) f32

    # Layer 1: two accumulating dots (fused-concat equivalent), bf16 MXU,
    # f32 accumulation; bias + ReLU in f32 on the VPU.
    h1 = jnp.dot(w1s_ref[...], st.astype(jnp.bfloat16),
                 preferred_element_type=jnp.float32)
    h1 = h1 + jnp.dot(w1a_ref[...], ac.astype(jnp.bfloat16),
                      preferred_element_type=jnp.float32)
    h1 = jnp.maximum(h1 + b1_ref[...], 0.0)            # (H, TB)

    # Layer 2
    h2 = jnp.dot(w2_ref[...], h1.astype(jnp.bfloat16),
                 preferred_element_type=jnp.float32)
    h2 = jnp.maximum(h2 + b2_ref[...], 0.0)            # (H, TB)

    # Layer 3 (delta) + residual (residual reuses the f32 state ref).
    delta = jnp.dot(w3_ref[...], h2.astype(jnp.bfloat16),
                    preferred_element_type=jnp.float32) + b3_ref[...]
    out_ref[...] = (st + delta).astype(out_ref.dtype)  # (S, TB)


def mlp_forward(state, action, params, *, tile_b=1024):
    """state: (B, S) or (S,); action: (B, A), (A,), or (B, 1, A).

    params are PyTorch-oriented: w* is (out_features, in_features), b* is (out,).
    """
    # --- dim glue (matches the PyTorch module) ---
    if state.ndim == 1:
        state = state[None, :]
    if action.ndim == 1:
        action = action[None, :]
    if action.ndim == 3:
        action = jnp.squeeze(action, axis=1)

    w1, b1, w2, b2, w3, b3 = params
    B, S = state.shape
    A = action.shape[-1]
    H = w1.shape[0]
    assert w1.shape == (H, S + A), "w1 must be (H, S+A) (PyTorch orientation)"

    # bf16 MXU operands (split the fused layer-1 weight into state/action halves);
    # biases stay f32 and are shaped (out, 1) to broadcast over the lane axis.
    w1s = w1[:, :S].astype(jnp.bfloat16)               # (H, S)
    w1a = w1[:, S:].astype(jnp.bfloat16)               # (H, A)
    w2b = w2.astype(jnp.bfloat16)                      # (H, H)
    w3b = w3.astype(jnp.bfloat16)                      # (S, H)
    b1c = b1.reshape(H, 1).astype(jnp.float32)
    b2c = b2.reshape(H, 1).astype(jnp.float32)
    b3c = b3.reshape(S, 1).astype(jnp.float32)

    # Lane-dense transposed activations: batch on the last (lane) axis.
    st_t = state.T.astype(jnp.float32)                 # (S, B)
    ac_t = action.T.astype(jnp.float32)                # (A, B)

    # Batch tiling on the lane axis: tiles are multiples of 128.  When more
    # than one step is needed, use an even step count so the "parallel" grid
    # axis splits evenly across v7x's two TensorCores.
    tb_cap = min(_round_up(tile_b, 128), _round_up(B, 128))
    n_tiles = _cdiv(B, tb_cap)
    if n_tiles > 1 and n_tiles % 2 == 1:
        n_tiles += 1
    tb = _round_up(_cdiv(B, n_tiles), 128)
    b_pad = tb * n_tiles
    if b_pad != B:
        pad = b_pad - B
        st_t = jnp.pad(st_t, ((0, 0), (0, pad)))
        ac_t = jnp.pad(ac_t, ((0, 0), (0, pad)))

    def batch_spec(feat):
        return pl.BlockSpec((feat, tb), lambda i: (0, i))

    def const_spec(a):
        # Whole array, same block every grid step -> stays VMEM-resident.
        return pl.BlockSpec(a.shape, lambda i: (0, 0))

    flops = 2 * b_pad * H * (S + A) + 2 * b_pad * H * H + 2 * b_pad * H * S
    bytes_accessed = (4 * b_pad * (S + A + S)                 # activations in/out (f32)
                      + 2 * (H * (S + A) + H * H + S * H)     # bf16 weights
                      + 4 * (2 * H + S))                      # f32 biases

    out_t = pl.pallas_call(
        _mlp_kernel,
        grid=(n_tiles,),
        out_shape=jax.ShapeDtypeStruct((S, b_pad), jnp.float32),
        in_specs=[batch_spec(S), batch_spec(A),
                  const_spec(w1s), const_spec(w1a), const_spec(b1c),
                  const_spec(w2b), const_spec(b2c),
                  const_spec(w3b), const_spec(b3c)],
        out_specs=pl.BlockSpec((S, tb), lambda i: (0, i)),
        compiler_params=pltpu.CompilerParams(
            dimension_semantics=("parallel",)),
        cost_estimate=pl.CostEstimate(flops=flops, transcendentals=0,
                                      bytes_accessed=bytes_accessed),
    )(st_t, ac_t, w1s, w1a, b1c, w2b, b2c, w3b, b3c)

    # Back to batch-major; strip batch padding.
    return out_t[:, :B].T.astype(state.dtype)


def init_params(key, state_dim, action_dim, hidden_dim=128):
    """Xavier-uniform weights in PyTorch (out, in) orientation, zero biases."""
    def xavier(k, fan_out, fan_in):
        bound = math.sqrt(6.0 / (fan_in + fan_out))
        return jax.random.uniform(k, (fan_out, fan_in), jnp.float32, -bound, bound)

    k1, k2, k3 = jax.random.split(key, 3)
    in_dim = state_dim + action_dim
    w1 = xavier(k1, hidden_dim, in_dim)                # (H, S+A)
    b1 = jnp.zeros((hidden_dim,), jnp.float32)
    w2 = xavier(k2, hidden_dim, hidden_dim)            # (H, H)
    b2 = jnp.zeros((hidden_dim,), jnp.float32)
    w3 = xavier(k3, state_dim, hidden_dim)             # (S, H)
    b3 = jnp.zeros((state_dim,), jnp.float32)
    return (w1, b1, w2, b2, w3, b3)


def _prep(state, action):
    if state.ndim == 1:
        state = state[None, :]
    if action.ndim == 1:
        action = action[None, :]
    if action.ndim == 3:
        action = jnp.squeeze(action, axis=1)
    return state, action


def mlp_ref_f32(state, action, params):
    """Pure-JAX f32 reference (exact semantics of the PyTorch module)."""
    state, action = _prep(state, action)
    w1, b1, w2, b2, w3, b3 = params
    x = jnp.concatenate([state, action], axis=-1)
    h1 = jnp.maximum(x @ w1.T + b1, 0.0)
    h2 = jnp.maximum(h1 @ w2.T + b2, 0.0)
    delta = h2 @ w3.T + b3
    return state + delta


def mlp_ref_bf16(state, action, params):
    """Pure-JAX reference that mimics the kernel's bf16-operand / f32-accum dots."""
    state, action = _prep(state, action)
    w1, b1, w2, b2, w3, b3 = params
    S = state.shape[-1]

    def d(a, b):
        return jnp.dot(a.astype(jnp.bfloat16), b.astype(jnp.bfloat16),
                       preferred_element_type=jnp.float32)

    h1 = d(state, w1[:, :S].T) + d(action, w1[:, S:].T) + b1
    h1 = jnp.maximum(h1, 0.0)
    h2 = jnp.maximum(d(h1, w2.T) + b2, 0.0)
    delta = d(h2, w3.T) + b3
    return state + delta


if __name__ == "__main__":
    key = jax.random.PRNGKey(0)
    k_state, k_action, k_params, k_state2, k_action2, k_params2 = jax.random.split(key, 6)

    # --- small demo shape (single grid step, padded to one 128-lane tile) ---
    state_dim, action_dim, hidden_dim = 4, 2, 32
    batch = 8
    state = jax.random.normal(k_state, (batch, state_dim), jnp.float32)
    action = jax.random.normal(k_action, (batch, action_dim), jnp.float32)
    params = init_params(k_params, state_dim, action_dim, hidden_dim)

    out = jax.block_until_ready(mlp_forward(state, action, params))
    assert out.shape == (batch, state_dim)
    assert jnp.allclose(out, mlp_ref_bf16(state, action, params),
                        atol=1e-3, rtol=1e-3), "mismatch vs bf16 reference (small)"
    assert jnp.allclose(out, mlp_ref_f32(state, action, params),
                        atol=3e-2, rtol=3e-2), "mismatch vs f32 reference (small)"

    # --- larger batch: exercises batch tiling, padding, even grid, resident weights ---
    state_dim2, action_dim2, hidden_dim2 = 4, 2, 128
    batch2 = 1030                                   # -> 2 tiles of 640 lanes (padded to 1280)
    state2 = jax.random.normal(k_state2, (batch2, state_dim2), jnp.float32)
    action2 = jax.random.normal(k_action2, (batch2, action_dim2), jnp.float32)
    params2 = init_params(k_params2, state_dim2, action_dim2, hidden_dim2)

    out2 = jax.block_until_ready(mlp_forward(state2, action2, params2))
    assert out2.shape == (batch2, state_dim2)
    assert jnp.allclose(out2, mlp_ref_bf16(state2, action2, params2),
                        atol=1e-3, rtol=1e-3), "mismatch vs bf16 reference (tiled)"
    assert jnp.allclose(out2, mlp_ref_f32(state2, action2, params2),
                        atol=3e-2, rtol=3e-2), "mismatch vs f32 reference (tiled)"

    print("KERNEL_OK")
</pallas_src>

<mosaic_0001>
module attributes {stable_mosaic.version = 11 : i64} {
  func.func @_mlp_kernel(%arg0: i32, %arg1: memref<4x128xf32, #tpu.memory_space<vmem>>, %arg2: memref<2x128xf32, #tpu.memory_space<vmem>>, %arg3: memref<32x4xbf16, #tpu.memory_space<vmem>>, %arg4: memref<32x2xbf16, #tpu.memory_space<vmem>>, %arg5: memref<32x1xf32, #tpu.memory_space<vmem>>, %arg6: memref<32x32xbf16, #tpu.memory_space<vmem>>, %arg7: memref<32x1xf32, #tpu.memory_space<vmem>>, %arg8: memref<4x32xbf16, #tpu.memory_space<vmem>>, %arg9: memref<4x1xf32, #tpu.memory_space<vmem>>, %arg10: memref<4x128xf32, #tpu.memory_space<vmem>>) attributes {dimension_semantics = [#tpu.dimension_semantics<parallel>], iteration_bounds = array<i64: 1>, scalar_prefetch = 0 : i64, scratch_operands = 0 : i64, tpu.core_type = #tpu.core_type<tc>, window_params = [{transform_indices = @transform_0, window_bounds = array<i64: 4, 128>}, {transform_indices = @transform_1, window_bounds = array<i64: 2, 128>}, {pipeline_mode = #tpu.pipeline_mode<synchronous>, transform_indices = @transform_2, window_bounds = array<i64: 32, 4>}, {pipeline_mode = #tpu.pipeline_mode<synchronous>, transform_indices = @transform_3, window_bounds = array<i64: 32, 2>}, {pipeline_mode = #tpu.pipeline_mode<synchronous>, transform_indices = @transform_4, window_bounds = array<i64: 32, 1>}, {pipeline_mode = #tpu.pipeline_mode<synchronous>, transform_indices = @transform_5, window_bounds = array<i64: 32, 32>}, {pipeline_mode = #tpu.pipeline_mode<synchronous>, transform_indices = @transform_6, window_bounds = array<i64: 32, 1>}, {pipeline_mode = #tpu.pipeline_mode<synchronous>, transform_indices = @transform_7, window_bounds = array<i64: 4, 32>}, {pipeline_mode = #tpu.pipeline_mode<synchronous>, transform_indices = @transform_8, window_bounds = array<i64: 4, 1>}, {transform_indices = @transform_9, window_bounds = array<i64: 4, 128>}]} {
    %c0 = arith.constant 0 : index
    %c0_0 = arith.constant 0 : index
    %0 = vector.load %arg1[%c0, %c0_0] : memref<4x128xf32, #tpu.memory_space<vmem>>, vector<4x128xf32>
    %c0_1 = arith.constant 0 : index
    %c0_2 = arith.constant 0 : index
    %1 = vector.load %arg2[%c0_1, %c0_2] : memref<2x128xf32, #tpu.memory_space<vmem>>, vector<2x128xf32>
    %c0_3 = arith.constant 0 : index
    %c0_4 = arith.constant 0 : index
    %2 = vector.load %arg3[%c0_3, %c0_4] : memref<32x4xbf16, #tpu.memory_space<vmem>>, vector<32x4xbf16>
    %3 = arith.truncf %0 : vector<4x128xf32> to vector<4x128xbf16>
    %cst = arith.constant dense<0.000000e+00> : vector<32x128xf32>
    %4 = tpu.matmul %2, %3, %cst {dimension_numbers = #tpu.dot_dimension_numbers<[1], [0], [0], [1], [0, 0, 1, 1], [], []>} : vector<32x4xbf16>, vector<4x128xbf16>, vector<32x128xf32> -> vector<32x128xf32>
    %c0_5 = arith.constant 0 : index
    %c0_6 = arith.constant 0 : index
    %5 = vector.load %arg4[%c0_5, %c0_6] : memref<32x2xbf16, #tpu.memory_space<vmem>>, vector<32x2xbf16>
    %6 = arith.truncf %1 : vector<2x128xf32> to vector<2x128xbf16>
    %cst_7 = arith.constant dense<0.000000e+00> : vector<32x128xf32>
    %7 = tpu.matmul %5, %6, %cst_7 {dimension_numbers = #tpu.dot_dimension_numbers<[1], [0], [0], [1], [0, 0, 1, 1], [], []>} : vector<32x2xbf16>, vector<2x128xbf16>, vector<32x128xf32> -> vector<32x128xf32>
    %8 = arith.addf %4, %7 : vector<32x128xf32>
    %c0_8 = arith.constant 0 : index
    %c0_9 = arith.constant 0 : index
    %9 = vector.load %arg5[%c0_8, %c0_9] : memref<32x1xf32, #tpu.memory_space<vmem>>, vector<32x1xf32>
    %10 = vector.broadcast %9 : vector<32x1xf32> to vector<32x128xf32>
    %11 = arith.addf %8, %10 : vector<32x128xf32>
    %cst_10 = arith.constant 0.000000e+00 : f32
    %12 = vector.broadcast %cst_10 : f32 to vector<32x128xf32>
    %13 = arith.maximumf %11, %12 : vector<32x128xf32>
    %c0_11 = arith.constant 0 : index
    %c0_12 = arith.constant 0 : index
    %14 = vector.load %arg6[%c0_11, %c0_12] : memref<32x32xbf16, #tpu.memory_space<vmem>>, vector<32x32xbf16>
    %15 = arith.truncf %13 : vector<32x128xf32> to vector<32x128xbf16>
    %cst_13 = arith.constant dense<0.000000e+00> : vector<32x128xf32>
    %16 = tpu.matmul %14, %15, %cst_13 {dimension_numbers = #tpu.dot_dimension_numbers<[1], [0], [0], [1], [0, 0, 1, 1], [], []>} : vector<32x32xbf16>, vector<32x128xbf16>, vector<32x128xf32> -> vector<32x128xf32>
    %c0_14 = arith.constant 0 : index
    %c0_15 = arith.constant 0 : index
    %17 = vector.load %arg7[%c0_14, %c0_15] : memref<32x1xf32, #tpu.memory_space<vmem>>, vector<32x1xf32>
    %18 = vector.broadcast %17 : vector<32x1xf32> to vector<32x128xf32>
    %19 = arith.addf %16, %18 : vector<32x128xf32>
    %cst_16 = arith.constant 0.000000e+00 : f32
    %20 = vector.broadcast %cst_16 : f32 to vector<32x128xf32>
    %21 = arith.maximumf %19, %20 : vector<32x128xf32>
    %c0_17 = arith.constant 0 : index
    %c0_18 = arith.constant 0 : index
    %22 = vector.load %arg8[%c0_17, %c0_18] : memref<4x32xbf16, #tpu.memory_space<vmem>>, vector<4x32xbf16>
    %23 = arith.truncf %21 : vector<32x128xf32> to vector<32x128xbf16>
    %cst_19 = arith.constant dense<0.000000e+00> : vector<4x128xf32>
    %24 = tpu.matmul %22, %23, %cst_19 {dimension_numbers = #tpu.dot_dimension_numbers<[1], [0], [0], [1], [0, 0, 1, 1], [], []>} : vector<4x32xbf16>, vector<32x128xbf16>, vector<4x128xf32> -> vector<4x128xf32>
    %c0_20 = arith.constant 0 : index
    %c0_21 = arith.constant 0 : index
    %25 = vector.load %arg9[%c0_20, %c0_21] : memref<4x1xf32, #tpu.memory_space<vmem>>, vector<4x1xf32>
    %26 = vector.broadcast %25 : vector<4x1xf32> to vector<4x128xf32>
    %27 = arith.addf %24, %26 : vector<4x128xf32>
    %28 = arith.addf %0, %27 : vector<4x128xf32>
    %c0_22 = arith.constant 0 : index
    %c0_23 = arith.constant 0 : index
    %29 = vector.load %arg10[%c0_22, %c0_23] : memref<4x128xf32, #tpu.memory_space<vmem>>, vector<4x128xf32>
    tpu.vector_store %arg10[%c0_22, %c0_23], %28 {strides = array<i32>} : memref<4x128xf32, #tpu.memory_space<vmem>>, vector<4x128xf32>,
    return
  }
  func.func @transform_0(%arg0: i32) -> (i32, i32) {
    %c0_i32 = arith.constant 0 : i32
    %c0_i32_0 = arith.constant 0 : i32
    return %c0_i32, %arg0 : i32, i32
  }
  func.func @transform_1(%arg0: i32) -> (i32, i32) {
    %c0_i32 = arith.constant 0 : i32
    %c0_i32_0 = arith.constant 0 : i32
    return %c0_i32, %arg0 : i32, i32
  }
  func.func @transform_2(%arg0: i32) -> (i32, i32) {
    %c0_i32 = arith.constant 0 : i32
    %c0_i32_0 = arith.constant 0 : i32
    %c0_i32_1 = arith.constant 0 : i32
    return %c0_i32, %c0_i32_0 : i32, i32
  }
  func.func @transform_3(%arg0: i32) -> (i32, i32) {
    %c0_i32 = arith.constant 0 : i32
    %c0_i32_0 = arith.constant 0 : i32
    %c0_i32_1 = arith.constant 0 : i32
    return %c0_i32, %c0_i32_0 : i32, i32
  }
  func.func @transform_4(%arg0: i32) -> (i32, i32) {
    %c0_i32 = arith.constant 0 : i32
    %c0_i32_0 = arith.constant 0 : i32
    %c0_i32_1 = arith.constant 0 : i32
    return %c0_i32, %c0_i32_0 : i32, i32
  }
  func.func @transform_5(%arg0: i32) -> (i32, i32) {
    %c0_i32 = arith.constant 0 : i32
    %c0_i32_0 = arith.constant 0 : i32
    %c0_i32_1 = arith.constant 0 : i32
    return %c0_i32, %c0_i32_0 : i32, i32
  }
  func.func @transform_6(%arg0: i32) -> (i32, i32) {
    %c0_i32 = arith.constant 0 : i32
    %c0_i32_0 = arith.constant 0 : i32
    %c0_i32_1 = arith.constant 0 : i32
    return %c0_i32, %c0_i32_0 : i32, i32
  }
  func.func @transform_7(%arg0: i32) -> (i32, i32) {
    %c0_i32 = arith.constant 0 : i32
    %c0_i32_0 = arith.constant 0 : i32
    %c0_i32_1 = arith.constant 0 : i32
    return %c0_i32, %c0_i32_0 : i32, i32
  }
  func.func @transform_8(%arg0: i32) -> (i32, i32) {
    %c0_i32 = arith.constant 0 : i32
    %c0_i32_0 = arith.constant 0 : i32
    %c0_i32_1 = arith.constant 0 : i32
    return %c0_i32, %c0_i32_0 : i32, i32
  }
  func.func @transform_9(%arg0: i32) -> (i32, i32) {
    %c0_i32 = arith.constant 0 : i32
    %c0_i32_0 = arith.constant 0 : i32
    return %c0_i32, %arg0 : i32, i32
  }
}

</mosaic_0001>

<bundles_post_ra>
// kernel: tpu_custom_call.1
= control target key start
LH: loop header
LB: loop body
LE: loop exit
PB: predicated region body
PF: predicated region fallthrough
CT: control target
= control target key end

     0   :  { %vm63_vm0 = vcmask 1040384   ;;  %vm56_vm1 = vcmask 15360   ;;  %vm133_vm2 = vcmask 1041408   ;;  %vm126_vm3 = vcmask 31744   ;;  %s614_s0 = inlined_call_operand.vmem [shape: f32[4,128], index: 0, kind: input, shape index: {}]   ;;  %s615_s1 = inlined_call_operand.vmem [shape: f32[2,128], index: 1, kind: input, shape index: {}]   ;;  %s616_s2 = inlined_call_operand.vmem [shape: bf16[32,4], index: 2, kind: input, shape index: {}]   ;;  %s617_s3 = inlined_call_operand.vmem [shape: bf16[32,2], index: 3, kind: input, shape index: {}]   ;;  %s618_s4 = inlined_call_operand.vmem [shape: f32[32,1], index: 4, kind: input, shape index: {}]   ;;  %s619_s5 = inlined_call_operand.vmem [shape: bf16[32,32], index: 5, kind: input, shape index: {}]   ;;  %s620_s6 = inlined_call_operand.vmem [shape: f32[32,1], index: 6, kind: input, shape index: {}]   ;;  %s621_s7 = inlined_call_operand.vmem [shape: bf16[4,32], index: 7, kind: input, shape index: {}]   ;;  %s622_s8 = inlined_call_operand.vmem [shape: f32[4,1], index: 8, kind: input, shape index: {}]   ;;  %s623_s9 = inlined_call_operand.hbm [shape: f32[4,128], index: 9, kind: output, shape index: {}]  }
   0x1   :  { %v35_v0 = vld [vmem:[%s615_s1] sm:$0x3]  ;;  %v453_v5 = vld [vmem:[%s617_s3 + $0x8] sm:$0xff]   ;;  %v482_v9 = vmov 0   ;;  %v188_v11 = vld [vmem:[%s618_s4 + $0x10] sm:$0xff] }
   0x2   :  { %v452_v1 = vld [vmem:[%s617_s3] sm:$0xff]   ;;  %v45_v2 = vpack.c.bf16 %v35_v0, %v35_v0  ;;  %450 = vset.pattern.permute.xlu0 %v482_v9  ;;  %451 = vset.pattern.permute.xlu1 %v482_v9  ;;  %v187_v12 = vld [vmem:[%s618_s4 + $0x8] sm:$0xff]  ;;  %v189_v13 = vld [vmem:[%s618_s4 + $0x18] sm:$0xff] }
   0x3   :  { %414 = vmatprep.mubr.msk.bf16.mxu0 %vm56_vm1, %v452_v1  ;;  %v546_v3 = vld [vmem:[%s614_s0] sm:$0xf]  ;;  %202 = vperm.xlu1 %451, %v188_v11  }
   0x4   :  { %444 = vmatprep.subr.msk.bf16.mxu0 %vm63_vm0, %v45_v2  ;;  %v65_v4 = vsel %vm63_vm0, %v45_v2, 0  ;;  %v40_v6 = vpack.c.bf16 %v546_v3, %v546_v3  ;;  %v454_v7 = vld [vmem:[%s616_s2] sm:$0xff]  }
   0x5   :  { %413 = vmatpush3.bf16.msra.mxu0 %v65_v4  ;;  %v186_v10 = vld [vmem:[%s618_s4] sm:$0xff] }
   0x6   :  { %445 = vmatprep.subr.msk.bf16.mxu0 %vm133_vm2, %v40_v6  ;;  %v135_v8 = vsel %vm133_vm2, %v40_v6, 0  ;;  %192 = vperm.xlu0 %450, %v186_v10  }
   0x8   :  { %415 = vmatmul.mubr.msk.bf16.vlgmr.msra.gmra.mrb[0].mxu0 %vm56_vm1, %v453_v5 }
   0x9   :  { %419 = vmatpush3.bf16.msra.mxu0 %v135_v8  ;;  %420 = vmatprep.mubr.msk.bf16.mxu0 %vm126_vm3, %v454_v7 }
   0xa   :  { %14 = vsyncpa [#allocation3], 0  ;;  %197 = vperm.xlu0 %450, %v187_v12   ;;  %v224_v14 = vld [vmem:[%s620_s6] sm:$0xff]  ;;  %207 = vperm.xlu1 %451, %v189_v13   ;;  %v225_v15 = vld [vmem:[%s620_s6 + $0x8] sm:$0xff]  ;;  %vm258_vm4 = vcmask 261120   ;;  %v483_v40 = vmov 0.0  }
   0xb   :  { %v455_v16 = vld [vmem:[%s616_s2 + $0x8] sm:$0xff]   ;;  %v226_v17 = vld [vmem:[%s620_s6 + $0x10] sm:$0xff]  ;;  %v227_v18 = vld [vmem:[%s620_s6 + $0x18] sm:$0xff]  ;;  %vm484_vm5 = vmmov 0   ;;  %s485_s16 = smov [#allocation2]  }
   0xc   :  { %v321_v19 = vld [vmem:[%s622_s8] sm:$0xf]  ;;  %v457_v39 = vld [vmem:[%s619_s5 + $0x8] sm:$0xff]   ;;  %s378_s1 = sshll.u32 %s485_s16, 4  ;;  %s379_s1 = int_to_ptr.vmem [resolvable:$true] %s378_s1 }
   0xd   :  { %v456_v20 = vld [vmem:[%s619_s5] sm:$0xff]   ;;  %s458_s17 = scalar_lea.vmem %s379_s1, 64  ;;  %p463_p1 = scmp.lt.s32.totalorder %s379_s1, %s379_s1 }
   0xe   :  { %230 = vperm.xlu0 %450, %v224_v14   ;;  %235 = vperm.xlu1 %451, %v225_v15   ;;  %v318_v59 = vld [vmem:[%s621_s7] sm:$0x3]  ;;  %p459_p0 = scmp.ne.s32.totalorder %s379_s1, %s458_s17  ;;  %p464_p2 = scmp.lt.s32.totalorder %s458_s17, %s458_s17 }
   0xf   :  { %428 = vmatprep.mubr.msk.bf16.mxu1 %vm258_vm4, %v456_v20 }
  0x10   :  { %p465_p3 = por %p464_p2, %p463_p1 }
  0x12   :  { %240 = vperm.xlu0 %450, %v226_v17   ;;  %245 = vperm.xlu1 %451, %v227_v18   ;;  %p466_p4 = pnand %p465_p3, %p459_p0 }
  0x14   :  { %421 = vmatmul.mubr.msk.bf16.vlgmr.msra.gmra.mrb[0].mxu0 %vm126_vm3, %v455_v16 }
  0x16   :  { %324 = vperm.xlu0 %450, %v321_v19  }
  0x82   :  { %v203_v21 = vpop.permute.xlu1 %202 }
  0x85   :  { %v193_v22 = vpop.permute.xlu0 %192 }
  0x89   :  { %v208_v26 = vpop.permute.xlu1 %207  ;;  %v198_v29 = vpop.permute.xlu0 %197 }
  0x8d   :  { %v231_v41 = vpop.permute.xlu0 %230  ;;  %v236_v42 = vpop.permute.xlu1 %235 }
  0x91   :  { %v241_v43 = vpop.permute.xlu0 %240  ;;  %v246_v47 = vpop.permute.xlu1 %245 }
  0x95   :  { %v325_v60 = vpop.permute.xlu0 %324 }
  0xe7   :  { %v422_v23 = vpop.f32.mrb[0].mxu0 }
  0xe8   :  { %v212_v24 = vadd.f32 %v422_v23, %v203_v21  ;;  %v171_v25 = vpop.f32.mrb[1].mxu0 }
  0xe9   :  { %v210_v27 = vadd.f32 %v193_v22, %v171_v25  ;;  %v423_v28 = vpop.f32.mrb[2].mxu0 }
  0xea   :  { %v213_v30 = vadd.f32 %v423_v28, %v208_v26  ;;  %v174_v31 = vpop.f32.mrb[3].mxu0  ;;  %v216_v33 = vmax.f32 %v212_v24, 0.0 }
  0xeb   :  { %v211_v32 = vadd.f32 %v198_v29, %v174_v31  ;;  %v214_v35 = vmax.f32 %v210_v27, 0.0 }
  0xec   :  { %v217_v34 = vmax.f32 %v213_v30, 0.0 }
  0xed   :  { %v215_v36 = vmax.f32 %v211_v32, 0.0 }
  0xee   :  { %v223_v37 = vpack.c.bf16 %v217_v34, %v216_v33 }
  0xef   :  { %v222_v38 = vpack.c.bf16 %v215_v36, %v214_v35 }
  0xf1   :  { %424 = vmatprep.subr.bf16.mxu1 %v222_v38 }
  0xf2   :  { %425 = vmatpush3.bf16.msra.mxu1 %v222_v38 }
  0xf3   :  { %426 = vmatprep.subr.bf16.mxu1 %v223_v37 }
  0xf6   :  { %427 = vmatpush3.bf16.msra.mxu1 %v223_v37 }
  0xf7   :  { %432 = vmatprep.subr.bf16.mxu1 %v483_v40 }
  0xf9   :  { %429 = vmatmul.mubr.msk.bf16.vlgmr.msra.gmra.mrb[0].mxu1 %vm258_vm4, %v457_v39 }
  0xfa   :  { %436 = vmatprep.mubr.msk.bf16.mxu1 %vm484_vm5, %v483_v40 }
 0x1cc   :  { %v430_v44 = vpop.f32.mrb[0].mxu1 }
 0x1cd   :  { %v308_v45 = vadd.f32 %v430_v44, %v241_v43  ;;  %v299_v46 = vpop.f32.mrb[1].mxu1 }
 0x1ce   :  { %v300_v48 = vadd.f32 %v299_v46, %v231_v41  ;;  %v431_v49 = vpop.f32.mrb[2].mxu1 }
 0x1cf   :  { %v311_v50 = vadd.f32 %v431_v49, %v246_v47  ;;  %v302_v51 = vpop.f32.mrb[3].mxu1  ;;  %v316_v53 = vmax.f32 %v308_v45, 0.0 }
 0x1d0   :  { %v303_v52 = vadd.f32 %v302_v51, %v236_v42  ;;  %v314_v55 = vmax.f32 %v300_v48, 0.0 }
 0x1d1   :  { %v317_v54 = vmax.f32 %v311_v50, 0.0 }
 0x1d2   :  { %v315_v56 = vmax.f32 %v303_v52, 0.0 }
 0x1d3   :  { %v320_v57 = vpack.c.bf16 %v317_v54, %v316_v53 }
 0x1d4   :  { %v319_v58 = vpack.c.bf16 %v315_v56, %v314_v55 }
 0x1d6   :  { %433 = vmatpush3.bf16.msra.mxu1 %v319_v58 }
 0x1d7   :  { %434 = vmatprep.subr.bf16.mxu1 %v483_v40 }
 0x1da   :  { %435 = vmatpush3.bf16.msra.mxu1 %v320_v57 }
 0x1dd   :  { %437 = vmatmul.mubr.msk.bf16.vlgmr.msra.gmra.mrb[4].mxu1 %vm258_vm4, %v318_v59 }
 0x2b0   :  { %v364_v61 = vpop.f32.mrb[4].mxu1 }
 0x2b1   :  { %v365_v62 = vadd.f32 %v364_v61, %v325_v60  ;;  %v438_v63 = vpop.f32.mrb[5].mxu1 }
 0x2b2   :  { %v367_v0 = vpop.f32.mrb[6].mxu1 }
 0x2b3   :  { %v439_v1 = vpop.f32.mrb[7].mxu1  ;;  %v370_v2 = vadd.f32 %v365_v62, %v546_v3 }
 0x2b5   :  { %371 = vst [vmem:[#allocation2] sm:$0xf] %v370_v2 }
 0x2b6   :  { %469 = shalt.err (!%p466_p4)
}
 0x2b7   :  { %s470_s18 = scalar_lea.hbm %s623_s9, 64 }
 0x2b8   :  { %p471_p5 = scmp.ne.s32.totalorder %s623_s9, %s470_s18  ;;  %p474_p6 = scmp.lt.u32.totalorder %s470_s18, %s623_s9 }
 0x2ba   :  { %p476_p7 = pnand %p474_p6, %p471_p5 }
 0x2bc   :  { %479 = shalt.err (!%p476_p7)
}
 0x2bd   :  { %381 = dma.vmem_to_hbm [thread:$0]  %s379_s1, 64, %s623_s9, [#allocation3]  }
 0x2be   :  { %480 = dma.done.wait [#allocation3], 64  }
 0x2bf   :  { %481 = vsyncadd [#allocation3], 4294967232 }
 0x2c0   :  { %385 = vsyncpa [#allocation3], 1 }

</bundles_post_ra>
